<compile_context>
chip_gen: v7x
topology: tpu7x:2x2x1
jax: 0.10.0
libtpu: 0.0.40
codegen_flags: <defaults>
</compile_context>

<pallas_src>
import functools

import jax
import jax.numpy as jnp
from jax import lax
from jax.experimental import pallas as pl
from jax.experimental.pallas import tpu as pltpu

EPS = 1e-5


# ---------------------------------------------------------------------------
# Fused kernel: conv1(1x1)+bn1+relu -> conv2(3x3)+bn2+relu -> conv3(1x1)+bn3
#               + residual + relu.   Activation layout: (C, lanes = imgs*HW).
# ---------------------------------------------------------------------------

def _bottleneck_kernel(W_img, BL, p_pad, cout,
                       x_ref, w1_ref, w2_ref, w3_ref, bias_ref, mask_ref,
                       o_ref):
    xb = x_ref[...]                                          # (Cin, BL) bf16

    # ---- conv1 (1x1) + bn1 + relu  (BN scale pre-folded into w1) ----
    h1 = jnp.dot(w1_ref[...], xb, preferred_element_type=jnp.float32)
    h1 = jnp.maximum(h1 + bias_ref[pl.ds(0, p_pad), :], 0.0)  # (p_pad, BL) f32

    # ---- conv2 (3x3, pad=1) as a single K=9*p_pad im2col matmul ----
    # 9 shifted taps via XLU lane rotation; boundary (and cross-image wrap)
    # handling via a precomputed resident 0/1 mask.  Taps are 8-row (sublane
    # aligned) f32 pieces -> the concat is a plain aligned copy.
    taps = []
    for dy in (-1, 0, 1):
        for dx in (-1, 0, 1):
            off = dy * W_img + dx
            taps.append(h1 if off == 0 else pltpu.roll(h1, (-off) % BL, 1))
    slab = (jnp.concatenate(taps, axis=0) * mask_ref[...]).astype(jnp.bfloat16)

    h2 = jnp.dot(w2_ref[...], slab, preferred_element_type=jnp.float32)
    h2 = jnp.maximum(h2 + bias_ref[pl.ds(p_pad, p_pad), :],
                     0.0).astype(jnp.bfloat16)               # (p_pad, BL)

    # ---- conv3 (1x1) + bn3 + residual add + relu ----
    out = jnp.dot(w3_ref[...], h2, preferred_element_type=jnp.float32)
    out = out + bias_ref[pl.ds(2 * p_pad, cout), :] + xb.astype(jnp.float32)
    o_ref[...] = jnp.maximum(out, 0.0).astype(jnp.bfloat16)  # lane-dense bf16 store


# ---------------------------------------------------------------------------
# Wrapper: BN folding, weight/mask layout, pallas_call
# ---------------------------------------------------------------------------

def _fold_bn(gamma, beta, mean, var):
    scale = gamma / jnp.sqrt(var + EPS)
    bias = beta - mean * scale
    return scale, bias


def _pad_rows(a, n):
    pad = n - a.shape[0]
    if pad <= 0:
        return a
    return jnp.concatenate([a, jnp.zeros((pad,) + a.shape[1:], a.dtype)], axis=0)


def bottleneck_forward(x_nchw, w1_oihw, bn1, w2_oihw, bn2, w3_oihw, bn3,
                       lane_target=512):
    # stride=1, downsample=None (identity block: inplanes == planes*4).
    # TODO(synk): stride>1 / downsample branch of Bottleneck is not implemented.
    N, Cin, H, W = x_nchw.shape
    planes = w1_oihw.shape[0]
    cout = w3_oihw.shape[0]
    assert Cin == cout, "identity residual requires inplanes == planes * 4"
    HW = H * W

    # sublane-aligned (f32 tile = 8 rows) padded channel count for h1/h2
    p_pad = max(8, -(-planes // 8) * 8)

    s1, b1 = _fold_bn(*bn1)
    s2, b2 = _fold_bn(*bn2)
    s3, b3 = _fold_bn(*bn3)

    # ---- weights: BN scale folded in, zero-padded to p_pad rows/cols, bf16 ----
    w1t = _pad_rows(w1_oihw[:, :, 0, 0] * s1[:, None], p_pad).astype(jnp.bfloat16)   # (p_pad, Cin)
    w2_s = jnp.transpose(w2_oihw, (0, 2, 3, 1)) * s2[:, None, None, None]            # (O, ky, kx, I)
    w2_pad = jnp.zeros((p_pad, 3, 3, p_pad), jnp.float32
                       ).at[:planes, :, :, :planes].set(w2_s)
    w2t = w2_pad.reshape(p_pad, 9 * p_pad).astype(jnp.bfloat16)                      # (p_pad, 9*p_pad)
    w3_s = w3_oihw[:, :, 0, 0] * s3[:, None]                                         # (cout, planes)
    w3t = jnp.concatenate(
        [w3_s, jnp.zeros((cout, p_pad - planes), jnp.float32)],
        axis=1).astype(jnp.bfloat16)                                                 # (cout, p_pad)

    # ---- merged bias column (b1 | b2 | b3); padded rows stay zero ----
    bias = jnp.concatenate([_pad_rows(b1, p_pad), _pad_rows(b2, p_pad), b3]
                           )[:, None].astype(jnp.float32)                            # (2*p_pad+cout, 1)

    # ---- batch packed into the lane axis: whole images per lane block ----
    ipb = max(1, min(N, lane_target // HW)) if HW < lane_target else 1
    while N % ipb:
        ipb -= 1
    BL = ipb * HW
    num_blocks = N // ipb
    # NOTE(v7x): with 2 TensorCores prefer num_blocks >= 2 once N is large
    # enough that each block still has >= ~512 lanes; at this toy size the
    # per-block work is trivial either way.

    x2d = jnp.transpose(x_nchw, (1, 0, 2, 3)).reshape(Cin, N * HW).astype(jnp.bfloat16)

    # ---- precomputed boundary masks for the 9 taps (resident constant) ----
    pos = jnp.arange(HW, dtype=jnp.int32)
    py, px = pos // W, pos % W
    rows = []
    for dy in (-1, 0, 1):
        for dx in (-1, 0, 1):
            valid = ((py + dy >= 0) & (py + dy < H) &
                     (px + dx >= 0) & (px + dx < W)).astype(jnp.float32)
            rows.append(jnp.broadcast_to(valid[None, :], (p_pad, HW)))
    mask = jnp.tile(jnp.concatenate(rows, axis=0), (1, ipb))                         # (9*p_pad, BL)

    kernel = functools.partial(_bottleneck_kernel, W, BL, p_pad, cout)

    out2d = pl.pallas_call(
        kernel,
        out_shape=jax.ShapeDtypeStruct((cout, N * HW), jnp.bfloat16),
        grid=(num_blocks,),
        in_specs=[
            pl.BlockSpec((Cin, BL), lambda l: (0, l)),              # x (lane tile)
            pl.BlockSpec((p_pad, Cin), lambda l: (0, 0)),           # w1 (resident)
            pl.BlockSpec((p_pad, 9 * p_pad), lambda l: (0, 0)),     # w2 (resident)
            pl.BlockSpec((cout, p_pad), lambda l: (0, 0)),          # w3 (resident)
            pl.BlockSpec((2 * p_pad + cout, 1), lambda l: (0, 0)),  # merged bias
            pl.BlockSpec((9 * p_pad, BL), lambda l: (0, 0)),        # tap mask
        ],
        out_specs=pl.BlockSpec((cout, BL), lambda l: (0, l)),
        compiler_params=pltpu.CompilerParams(
            dimension_semantics=("parallel",)),
        # TODO(synk): at real ResNet-50 sizes (Cin=256, planes=64, HW=3136)
        # re-derive the lane tile vs. VMEM budget (v7x: 64 MiB) and set
        # vmem_limit_bytes explicitly.
    )(x2d, w1t, w2t, w3t, bias, mask)

    return jnp.transpose(out2d.reshape(cout, N, H, W), (1, 0, 2, 3))


# ---------------------------------------------------------------------------
# Pure-JAX reference (inference-mode BN semantics) for verification
# ---------------------------------------------------------------------------

def bottleneck_ref(x_nchw, w1_oihw, bn1, w2_oihw, bn2, w3_oihw, bn3):
    def conv(x, w_oihw, pad=0):
        w_hwio = jnp.transpose(w_oihw, (2, 3, 1, 0))
        return lax.conv_general_dilated(
            x, w_hwio, window_strides=(1, 1),
            padding=[(pad, pad), (pad, pad)],
            dimension_numbers=("NCHW", "HWIO", "NCHW"),
            preferred_element_type=jnp.float32)

    def bn(x, p):
        gamma, beta, mean, var = p
        scale = gamma / jnp.sqrt(var + EPS)
        bias = beta - mean * scale
        return x * scale[None, :, None, None] + bias[None, :, None, None]

    out = jax.nn.relu(bn(conv(x_nchw, w1_oihw), bn1))
    out = jax.nn.relu(bn(conv(out, w2_oihw, pad=1), bn2))
    out = bn(conv(out, w3_oihw), bn3)
    return jax.nn.relu(out + x_nchw)


# ---------------------------------------------------------------------------

if __name__ == "__main__":
    key = jax.random.PRNGKey(0)
    ks = jax.random.split(key, 16)

    N, H, W = 2, 16, 16
    planes = 4
    inplanes = planes * 4          # 16, so downsample=None is valid

    # Conv weights in PyTorch OIHW layout, deterministic init
    w1_oihw = 0.1 * jax.random.normal(ks[0], (planes, inplanes, 1, 1), jnp.float32)
    w2_oihw = 0.1 * jax.random.normal(ks[1], (planes, planes, 3, 3), jnp.float32)
    w3_oihw = 0.1 * jax.random.normal(ks[2], (planes * 4, planes, 1, 1), jnp.float32)

    def make_bn(kg, kb, km, kv, c):
        gamma = 0.5 + jax.random.uniform(kg, (c,), jnp.float32)
        beta = 0.1 * jax.random.normal(kb, (c,), jnp.float32)
        mean = 0.1 * jax.random.normal(km, (c,), jnp.float32)
        var = 0.5 + jax.random.uniform(kv, (c,), jnp.float32)
        return (gamma, beta, mean, var)

    bn1 = make_bn(ks[3], ks[4], ks[5], ks[6], planes)
    bn2 = make_bn(ks[7], ks[8], ks[9], ks[10], planes)
    bn3 = make_bn(ks[11], ks[12], ks[13], ks[14], planes * 4)

    x = jax.random.normal(ks[15], (N, inplanes, H, W), jnp.float32)
    # Round the input once to bf16 so the residual path matches the reference
    # exactly; remaining differences come from bf16 matmul inputs / bf16 output.
    x = x.astype(jnp.bfloat16).astype(jnp.float32)

    out = bottleneck_forward(x, w1_oihw, bn1, w2_oihw, bn2, w3_oihw, bn3)
    jax.block_until_ready(out)

    ref = bottleneck_ref(x, w1_oihw, bn1, w2_oihw, bn2, w3_oihw, bn3)
    assert out.shape == ref.shape == (N, planes * 4, H, W)
    # bf16 matmul inputs + bf16 output vs f32 reference -> relaxed tolerance
    assert jnp.allclose(out.astype(jnp.float32), ref, atol=4e-2, rtol=4e-2), \
        "mismatch vs reference"

    print("KERNEL_OK")
</pallas_src>

<mosaic_0001>
module attributes {stable_mosaic.version = 11 : i64} {
  func.func @_bottleneck_kernel(%arg0: i32, %arg1: memref<16x512xbf16, #tpu.memory_space<vmem>>, %arg2: memref<8x16xbf16, #tpu.memory_space<vmem>>, %arg3: memref<8x72xbf16, #tpu.memory_space<vmem>>, %arg4: memref<16x8xbf16, #tpu.memory_space<vmem>>, %arg5: memref<32x1xf32, #tpu.memory_space<vmem>>, %arg6: memref<72x512xf32, #tpu.memory_space<vmem>>, %arg7: memref<16x512xbf16, #tpu.memory_space<vmem>>) attributes {dimension_semantics = [#tpu.dimension_semantics<parallel>], iteration_bounds = array<i64: 1>, scalar_prefetch = 0 : i64, scratch_operands = 0 : i64, tpu.core_type = #tpu.core_type<tc>, window_params = [{transform_indices = @transform_0, window_bounds = array<i64: 16, 512>}, {pipeline_mode = #tpu.pipeline_mode<synchronous>, transform_indices = @transform_1, window_bounds = array<i64: 8, 16>}, {pipeline_mode = #tpu.pipeline_mode<synchronous>, transform_indices = @transform_2, window_bounds = array<i64: 8, 72>}, {pipeline_mode = #tpu.pipeline_mode<synchronous>, transform_indices = @transform_3, window_bounds = array<i64: 16, 8>}, {pipeline_mode = #tpu.pipeline_mode<synchronous>, transform_indices = @transform_4, window_bounds = array<i64: 32, 1>}, {pipeline_mode = #tpu.pipeline_mode<synchronous>, transform_indices = @transform_5, window_bounds = array<i64: 72, 512>}, {transform_indices = @transform_6, window_bounds = array<i64: 16, 512>}]} {
    %c0 = arith.constant 0 : index
    %c0_0 = arith.constant 0 : index
    %0 = vector.load %arg1[%c0, %c0_0] : memref<16x512xbf16, #tpu.memory_space<vmem>>, vector<16x512xbf16>
    %c0_1 = arith.constant 0 : index
    %c0_2 = arith.constant 0 : index
    %1 = vector.load %arg2[%c0_1, %c0_2] : memref<8x16xbf16, #tpu.memory_space<vmem>>, vector<8x16xbf16>
    %cst = arith.constant dense<0.000000e+00> : vector<8x512xf32>
    %2 = tpu.matmul %1, %0, %cst {dimension_numbers = #tpu.dot_dimension_numbers<[1], [0], [0], [1], [0, 0, 1, 1], [], []>} : vector<8x16xbf16>, vector<16x512xbf16>, vector<8x512xf32> -> vector<8x512xf32>
    %c0_3 = arith.constant 0 : index
    %c0_4 = arith.constant 0 : index
    %3 = vector.load %arg5[%c0_3, %c0_4] : memref<32x1xf32, #tpu.memory_space<vmem>>, vector<8x1xf32>
    %4 = vector.broadcast %3 : vector<8x1xf32> to vector<8x512xf32>
    %5 = arith.addf %2, %4 : vector<8x512xf32>
    %cst_5 = arith.constant 0.000000e+00 : f32
    %6 = vector.broadcast %cst_5 : f32 to vector<8x512xf32>
    %7 = arith.maximumf %5, %6 : vector<8x512xf32>
    %c17_i32 = arith.constant 17 : i32
    %8 = tpu.dynamic_rotate %7 by %c17_i32 dim 1 : vector<8x512xf32>, i32 -> vector<8x512xf32>
    %c16_i32 = arith.constant 16 : i32
    %9 = tpu.dynamic_rotate %7 by %c16_i32 dim 1 : vector<8x512xf32>, i32 -> vector<8x512xf32>
    %c15_i32 = arith.constant 15 : i32
    %10 = tpu.dynamic_rotate %7 by %c15_i32 dim 1 : vector<8x512xf32>, i32 -> vector<8x512xf32>
    %c1_i32 = arith.constant 1 : i32
    %11 = tpu.dynamic_rotate %7 by %c1_i32 dim 1 : vector<8x512xf32>, i32 -> vector<8x512xf32>
    %c511_i32 = arith.constant 511 : i32
    %12 = tpu.dynamic_rotate %7 by %c511_i32 dim 1 : vector<8x512xf32>, i32 -> vector<8x512xf32>
    %c497_i32 = arith.constant 497 : i32
    %13 = tpu.dynamic_rotate %7 by %c497_i32 dim 1 : vector<8x512xf32>, i32 -> vector<8x512xf32>
    %c496_i32 = arith.constant 496 : i32
    %14 = tpu.dynamic_rotate %7 by %c496_i32 dim 1 : vector<8x512xf32>, i32 -> vector<8x512xf32>
    %c495_i32 = arith.constant 495 : i32
    %15 = tpu.dynamic_rotate %7 by %c495_i32 dim 1 : vector<8x512xf32>, i32 -> vector<8x512xf32>
    %16 = tpu.concatenate %8, %9, %10, %11, %7, %12, %13, %14, %15 in 0 : vector<8x512xf32>, vector<8x512xf32>, vector<8x512xf32>, vector<8x512xf32>, vector<8x512xf32>, vector<8x512xf32>, vector<8x512xf32>, vector<8x512xf32>, vector<8x512xf32> -> vector<72x512xf32>
    %c0_6 = arith.constant 0 : index
    %c0_7 = arith.constant 0 : index
    %17 = vector.load %arg6[%c0_6, %c0_7] : memref<72x512xf32, #tpu.memory_space<vmem>>, vector<72x512xf32>
    %18 = arith.mulf %16, %17 : vector<72x512xf32>
    %19 = arith.truncf %18 : vector<72x512xf32> to vector<72x512xbf16>
    %c0_8 = arith.constant 0 : index
    %c0_9 = arith.constant 0 : index
    %20 = vector.load %arg3[%c0_8, %c0_9] : memref<8x72xbf16, #tpu.memory_space<vmem>>, vector<8x72xbf16>
    %cst_10 = arith.constant dense<0.000000e+00> : vector<8x512xf32>
    %21 = tpu.matmul %20, %19, %cst_10 {dimension_numbers = #tpu.dot_dimension_numbers<[1], [0], [0], [1], [0, 0, 1, 1], [], []>} : vector<8x72xbf16>, vector<72x512xbf16>, vector<8x512xf32> -> vector<8x512xf32>
    %c8 = arith.constant 8 : index
    %c0_11 = arith.constant 0 : index
    %22 = vector.load %arg5[%c8, %c0_11] : memref<32x1xf32, #tpu.memory_space<vmem>>, vector<8x1xf32>
    %23 = vector.broadcast %22 : vector<8x1xf32> to vector<8x512xf32>
    %24 = arith.addf %21, %23 : vector<8x512xf32>
    %cst_12 = arith.constant 0.000000e+00 : f32
    %25 = vector.broadcast %cst_12 : f32 to vector<8x512xf32>
    %26 = arith.maximumf %24, %25 : vector<8x512xf32>
    %27 = arith.truncf %26 : vector<8x512xf32> to vector<8x512xbf16>
    %c0_13 = arith.constant 0 : index
    %c0_14 = arith.constant 0 : index
    %28 = vector.load %arg4[%c0_13, %c0_14] : memref<16x8xbf16, #tpu.memory_space<vmem>>, vector<16x8xbf16>
    %cst_15 = arith.constant dense<0.000000e+00> : vector<16x512xf32>
    %29 = tpu.matmul %28, %27, %cst_15 {dimension_numbers = #tpu.dot_dimension_numbers<[1], [0], [0], [1], [0, 0, 1, 1], [], []>} : vector<16x8xbf16>, vector<8x512xbf16>, vector<16x512xf32> -> vector<16x512xf32>
    %c16 = arith.constant 16 : index
    %c0_16 = arith.constant 0 : index
    %30 = vector.load %arg5[%c16, %c0_16] : memref<32x1xf32, #tpu.memory_space<vmem>>, vector<16x1xf32>
    %31 = vector.broadcast %30 : vector<16x1xf32> to vector<16x512xf32>
    %32 = arith.addf %29, %31 : vector<16x512xf32>
    %33 = arith.extf %0 : vector<16x512xbf16> to vector<16x512xf32>
    %34 = arith.addf %32, %33 : vector<16x512xf32>
    %cst_17 = arith.constant 0.000000e+00 : f32
    %35 = vector.broadcast %cst_17 : f32 to vector<16x512xf32>
    %36 = arith.maximumf %34, %35 : vector<16x512xf32>
    %37 = arith.truncf %36 : vector<16x512xf32> to vector<16x512xbf16>
    %c0_18 = arith.constant 0 : index
    %c0_19 = arith.constant 0 : index
    %38 = vector.load %arg7[%c0_18, %c0_19] : memref<16x512xbf16, #tpu.memory_space<vmem>>, vector<16x512xbf16>
    tpu.vector_store %arg7[%c0_18, %c0_19], %37 {strides = array<i32>} : memref<16x512xbf16, #tpu.memory_space<vmem>>, vector<16x512xbf16>,
    return
  }
  func.func @transform_0(%arg0: i32) -> (i32, i32) {
    %c0_i32 = arith.constant 0 : i32
    %c0_i32_0 = arith.constant 0 : i32
    return %c0_i32, %arg0 : i32, i32
  }
  func.func @transform_1(%arg0: i32) -> (i32, i32) {
    %c0_i32 = arith.constant 0 : i32
    %c0_i32_0 = arith.constant 0 : i32
    %c0_i32_1 = arith.constant 0 : i32
    return %c0_i32, %c0_i32_0 : i32, i32
  }
  func.func @transform_2(%arg0: i32) -> (i32, i32) {
    %c0_i32 = arith.constant 0 : i32
    %c0_i32_0 = arith.constant 0 : i32
    %c0_i32_1 = arith.constant 0 : i32
    return %c0_i32, %c0_i32_0 : i32, i32
  }
  func.func @transform_3(%arg0: i32) -> (i32, i32) {
    %c0_i32 = arith.constant 0 : i32
    %c0_i32_0 = arith.constant 0 : i32
    %c0_i32_1 = arith.constant 0 : i32
    return %c0_i32, %c0_i32_0 : i32, i32
  }
  func.func @transform_4(%arg0: i32) -> (i32, i32) {
    %c0_i32 = arith.constant 0 : i32
    %c0_i32_0 = arith.constant 0 : i32
    %c0_i32_1 = arith.constant 0 : i32
    return %c0_i32, %c0_i32_0 : i32, i32
  }
  func.func @transform_5(%arg0: i32) -> (i32, i32) {
    %c0_i32 = arith.constant 0 : i32
    %c0_i32_0 = arith.constant 0 : i32
    %c0_i32_1 = arith.constant 0 : i32
    return %c0_i32, %c0_i32_0 : i32, i32
  }
  func.func @transform_6(%arg0: i32) -> (i32, i32) {
    %c0_i32 = arith.constant 0 : i32
    %c0_i32_0 = arith.constant 0 : i32
    return %c0_i32, %arg0 : i32, i32
  }
}

</mosaic_0001>

<bundles_post_ra>
// kernel: tpu_custom_call.1
= control target key start
LH: loop header
LB: loop body
LE: loop exit
PB: predicated region body
PF: predicated region fallthrough
CT: control target
= control target key end

     0   :  { %11 = vsyncpa [#allocation3], 0  ;;  %s1086_s0 = inlined_call_operand.vmem [shape: bf16[16,512], index: 0, kind: input, shape index: {}]   ;;  %s1087_s1 = inlined_call_operand.vmem [shape: bf16[8,16], index: 1, kind: input, shape index: {}]   ;;  %s1088_s2 = inlined_call_operand.vmem [shape: bf16[8,72], index: 2, kind: input, shape index: {}]   ;;  %s1089_s3 = inlined_call_operand.vmem [shape: bf16[16,8], index: 3, kind: input, shape index: {}]   ;;  %s1090_s4 = inlined_call_operand.vmem [shape: f32[32,1], index: 4, kind: input, shape index: {}]   ;;  %s1091_s5 = inlined_call_operand.hbm [shape: f32[72,512], index: 5, kind: input, shape index: {}]   ;;  %s1092_s6 = inlined_call_operand.hbm [shape: bf16[16,512], index: 6, kind: output, shape index: {}]  }
   0x1   :  { %12 = vsyncpa [#allocation4], 0  ;;  %s754_s21 = smov [#allocation2]   ;;  %s706_s25 = scalar_lea.hbm %s1091_s5, 4608 }
   0x2   :  { %s28_s22 = sshll.u32 %s754_s21, 4  ;;  %p707_p0 = scmp.ne.s32.totalorder %s1091_s5, %s706_s25  ;;  %s29_s22 = int_to_ptr.vmem [resolvable:$true] %s28_s22 }
   0x3   :  { %p710_p1 = scmp.lt.u32.totalorder %s706_s25, %s1091_s5 }
   0x5   :  { %p712_p2 = pnand %p710_p1, %p707_p0 }
   0x7   :  { %715 = shalt.err (!%p712_p2)
}
   0x8   :  { %s716_s30 = scalar_lea.vmem %s29_s22, 4608  ;;  %p721_p4 = scmp.lt.s32.totalorder %s29_s22, %s29_s22 }
   0x9   :  { %p717_p3 = scmp.ne.s32.totalorder %s29_s22, %s716_s30  ;;  %p722_p5 = scmp.lt.s32.totalorder %s716_s30, %s716_s30 }
   0xb   :  { %p723_p6 = por %p722_p5, %p721_p4 }
   0xd   :  { %p724_p7 = pnand %p723_p6, %p717_p3 }
   0xf   :  { %727 = shalt.err (!%p724_p7)
}
  0x10   :  { %s755_s7 = smov 512   ;;  %s756_s8 = smov 32  }
  0x11   :  { %34 = dma.hbm_to_vmem [thread:$0]  %s1091_s5, 4608, %s29_s22, [#allocation3], %s755_s7, %s755_s7, %s756_s8  }
  0x12   :  { %750 = dma.done.wait [#allocation3], 4608  }
  0x13   :  { %751 = vsyncadd [#allocation3], 4294962688  ;;  %v757_v0 = vmov 0   ;;  %v822_v1 = vld [vmem:[%s1086_s0] sm:$0xff]  ;;  %v827_v2 = vld [vmem:[%s1086_s0 + $0x10] sm:$0xff]  ;;  %vm70_vm0 = vcmask 130048   ;;  %v168_v32 = vlaneseq }
  0x14   :  { %106 = vmatprep.mubr.bf16.mxu0 %v757_v0  ;;  %147 = vmatprep.mubr.bf16.mxu1 %v757_v0  ;;  %v832_v3 = vld [vmem:[%s1086_s0 + $0x8] sm:$0xff]  ;;  %v663_v4 = vcombine.high %v822_v1, %v827_v2  ;;  %v839_v5 = vld [vmem:[%s1086_s0 + $0x18] sm:$0xff]  ;;  %v662_v6 = vcombine.low %v822_v1, %v827_v2  ;;  %v44_v7 = vld [vmem:[%s1090_s4] sm:$0xff]  ;;  %s759_s21 = smov 16   ;;  %s760_s22 = smov 15   ;;  %vm369_vm9 = vcmask 1043456  }
  0x15   :  { %699 = vset.pattern.permute.xlu0 %v757_v0  ;;  %700 = vset.pattern.permute.xlu1 %v757_v0  ;;  %v665_v8 = vcombine.high %v832_v3, %v839_v5  ;;  %v664_v9 = vcombine.low %v832_v3, %v839_v5  ;;  %v43_v10 = vld [vmem:[%s1087_s1] sm:$0xf]  ;;  %s758_s1 = smov 17   ;;  %s761_s23 = smov 1   ;;  %v474_v28 = vld [vmem:[%s1090_s4 + $0x10] sm:$0xff]  ;;  %v359_v29 = vld [vmem:[%s1090_s4 + $0x8] sm:$0xff] }
  0x16   :  { %47 = vperm.xlu0 %699, %v44_v7   ;;  %74 = vmatprep.subr.bf16.mxu0 %v663_v4  ;;  %s762_s24 = smov 127   ;;  %s763_s25 = smov 113   ;;  %v475_v30 = vld [vmem:[%s1090_s4 + $0x18] sm:$0xff]  ;;  %v916_v34 = vand.u32 127, %v168_v32  ;;  %v270_v59 = vld [vmem:[#allocation2 + $0x20] sm:$0xff]  ;;  %v284_v62 = vld [vmem:[#allocation2 + $0x90] sm:$0xff] }
  0x17   :  { %115 = vmatprep.subr.bf16.mxu1 %v665_v8  ;;  %75 = vmatpush1.bf16.msra.mxu0 %v662_v6  ;;  %s764_s26 = smov 112   ;;  %s765_s27 = smov 111   ;;  %v269_v39 = vld [vmem:[#allocation2 + $0x18] sm:$0xff]  ;;  %v266_v63 = vld [vmem:[#allocation2] sm:$0xff]  ;;  %v283_v7 = vld [vmem:[#allocation2 + $0x88] sm:$0xff]  ;;  %vm365_vm10 = vcmask 588800  }
  0x18   :  { %116 = vmatpush1.bf16.msra.mxu1 %v664_v9  ;;  %vm170_vm1 = vcmp.lt.s32.totalorder %v916_v34, 17  ;;  %v273_v41 = vld [vmem:[#allocation2 + $0x38] sm:$0xff]  ;;  %vm183_vm2 = vcmp.lt.s32.totalorder %v916_v34, 16  ;;  %vm196_vm3 = vcmp.lt.s32.totalorder %v916_v34, 15  ;;  %v271_v8 = vld [vmem:[#allocation2 + $0x28] sm:$0xff]  ;;  %vm209_vm4 = vcmp.lt.s32.totalorder %v916_v34, 1 }
  0x19   :  { %v285_v6 = vld [vmem:[#allocation2 + $0x98] sm:$0xff]  ;;  %vm222_vm5 = vcmp.lt.s32.totalorder %v916_v34, 127  ;;  %vm235_vm6 = vcmp.lt.s32.totalorder %v916_v34, 113  ;;  %v268_v32 = vld [vmem:[#allocation2 + $0x10] sm:$0xff]  ;;  %vm248_vm7 = vcmp.lt.s32.totalorder %v916_v34, 112  ;;  %vm261_vm8 = vcmp.lt.s32.totalorder %v916_v34, 111 }
  0x1a   :  { %666 = vmatmul.mubr.msk.bf16.vlgmr.msra.gmra.mrb[0].mxu0 %vm70_vm0, %v43_v10  ;;  %v358_v34 = vld [vmem:[%s1088_s2] sm:$0xf]  ;;  %vm491_vm11 = vcmask 64512  }
  0x1b   :  { %667 = vmatmul.mubr.msk.bf16.vlgmr.msra.gmra.mrb[0].mxu1 %vm70_vm0, %v43_v10  ;;  %414 = vmatprep.mubr.bf16.mxu0 %v757_v0 }
  0x1c   :  { %455 = vmatprep.mubr.bf16.mxu1 %v757_v0 }
  0x95   :  { %v48_v11 = vpop.permute.xlu0 %47 }
  0xed   :  { %v108_v12 = vpop.f32.mrb[0].mxu0 }
  0xee   :  { %v109_v13 = vadd.f32 %v108_v12, %v48_v11  ;;  %v149_v14 = vpop.f32.mrb[0].mxu1  ;;  %v110_v15 = vpop.f32.mrb[1].mxu0  ;;  %v272_v12 = vld [vmem:[#allocation2 + $0x30] sm:$0xff] }
  0xef   :  { %v150_v16 = vadd.f32 %v149_v14, %v48_v11  ;;  %v151_v17 = vpop.f32.mrb[1].mxu1  ;;  %v112_v18 = vpop.f32.mrb[2].mxu0  ;;  %v111_v25 = vadd.f32 %v110_v15, %v48_v11 }
  0xf0   :  { %v855_v19 = vmax.f32 %v109_v13, 0.0  ;;  %v152_v20 = vadd.f32 %v151_v17, %v48_v11  ;;  %v153_v21 = vpop.f32.mrb[2].mxu1  ;;  %v113_v22 = vpop.f32.mrb[3].mxu0  ;;  %v275_v17 = vld [vmem:[#allocation2 + $0x48] sm:$0xff] }
  0xf1   :  { %v857_v23 = vmax.f32 %v150_v16, 0.0  ;;  %v154_v24 = vpop.f32.mrb[3].mxu1  ;;  %v869_v27 = vmax.f32 %v111_v25, 0.0 }
  0xf2   :  { %160 = vrot.lane.b32.xlu0 %v855_v19, %s758_s1  ;;  %v863_v26 = vmax.f32 %v152_v20, 0.0  ;;  %v281_v24 = vld [vmem:[#allocation2 + $0x78] sm:$0xff] }
  0xf3   :  { %164 = vrot.lane.b32.xlu1 %v857_v23, %s758_s1  ;;  %v953_v14 = vmul.f32 %v284_v62, %v857_v23  ;;  %v966_v21 = vmul.f32 %v283_v7, %v869_v27 }
  0xf4   :  { %v963_v20 = vmul.f32 %v285_v6, %v863_v26  ;;  %v287_v6 = vld [vmem:[#allocation2 + $0xa8] sm:$0xff] }
  0xf6   :  { %166 = vrot.lane.b32.xlu0 %v863_v26, %s758_s1 }
  0xf7   :  { %175 = vrot.lane.b32.xlu1 %v855_v19, %s759_s21 }
  0xfa   :  { %177 = vrot.lane.b32.xlu0 %v869_v27, %s759_s21 }
  0xfb   :  { %179 = vrot.lane.b32.xlu1 %v857_v23, %s759_s21 }
  0xfe   :  { %181 = vrot.lane.b32.xlu0 %v863_v26, %s759_s21 }
  0xff   :  { %188 = vrot.lane.b32.xlu1 %v855_v19, %s760_s22 }
 0x102   :  { %190 = vrot.lane.b32.xlu0 %v869_v27, %s760_s22 }
 0x103   :  { %192 = vrot.lane.b32.xlu1 %v857_v23, %s760_s22 }
 0x106   :  { %194 = vrot.lane.b32.xlu0 %v863_v26, %s760_s22 }
 0x107   :  { %201 = vrot.lane.b32.xlu1 %v855_v19, %s761_s23 }
 0x10a   :  { %203 = vrot.lane.b32.xlu0 %v869_v27, %s761_s23 }
 0x10b   :  { %205 = vrot.lane.b32.xlu1 %v857_v23, %s761_s23 }
 0x10e   :  { %207 = vrot.lane.b32.xlu0 %v863_v26, %s761_s23 }
 0x10f   :  { %214 = vrot.lane.b32.xlu1 %v855_v19, %s762_s24 }
 0x112   :  { %216 = vrot.lane.b32.xlu0 %v869_v27, %s762_s24 }
 0x113   :  { %218 = vrot.lane.b32.xlu1 %v857_v23, %s762_s24 }
 0x116   :  { %220 = vrot.lane.b32.xlu0 %v863_v26, %s762_s24 }
 0x117   :  { %227 = vrot.lane.b32.xlu1 %v855_v19, %s763_s25 }
 0x11a   :  { %229 = vrot.lane.b32.xlu0 %v869_v27, %s763_s25 }
 0x11b   :  { %231 = vrot.lane.b32.xlu1 %v857_v23, %s763_s25 }
 0x11e   :  { %233 = vrot.lane.b32.xlu0 %v863_v26, %s763_s25 }
 0x11f   :  { %162 = vrot.lane.b32.xlu1 %v869_v27, %s758_s1 }
 0x122   :  { %242 = vrot.lane.b32.xlu0 %v869_v27, %s764_s26 }
 0x123   :  { %240 = vrot.lane.b32.xlu1 %v855_v19, %s764_s26 }
 0x126   :  { %246 = vrot.lane.b32.xlu0 %v863_v26, %s764_s26 }
 0x127   :  { %244 = vrot.lane.b32.xlu1 %v857_v23, %s764_s26 }
 0x12a   :  { %255 = vrot.lane.b32.xlu0 %v869_v27, %s765_s27 }
 0x12b   :  { %253 = vrot.lane.b32.xlu1 %v855_v19, %s765_s27 }
 0x12e   :  { %259 = vrot.lane.b32.xlu0 %v863_v26, %s765_s27 }
 0x12f   :  { %257 = vrot.lane.b32.xlu1 %v857_v23, %s765_s27 }
 0x132   :  { %478 = vperm.xlu0 %699, %v474_v28  }
 0x133   :  { %362 = vperm.xlu1 %700, %v359_v29   ;;  %v279_v29 = vld [vmem:[#allocation2 + $0x68] sm:$0xff] }
 0x137   :  { %483 = vperm.xlu1 %700, %v475_v30   ;;  %v267_v30 = vld [vmem:[#allocation2 + $0x8] sm:$0xff] }
 0x164   :  { %v912_v31 = vpop.permute.xlu0 %160 }
 0x165   :  { %v914_v33 = vpop.permute.xlu1 %164 }
 0x168   :  { %v167_v35 = vpop.permute.xlu0 %166 }
 0x169   :  { %v176_v36 = vpop.permute.xlu1 %175  ;;  %v171_v40 = vsel %vm170_vm1, %v914_v33, %v167_v35  ;;  %v174_v4 = vsel %vm170_vm1, %v167_v35, %v912_v31 }
 0x16a   :  { %v305_v45 = vmul.f32 %v269_v39, %v171_v40  ;;  %v957_v16 = vmul.f32 %v266_v63, %v174_v4  ;;  %v280_v39 = vld [vmem:[#allocation2 + $0x70] sm:$0xff] }
 0x16c   :  { %v178_v37 = vpop.permute.xlu0 %177 }
 0x16d   :  { %v180_v38 = vpop.permute.xlu1 %179  ;;  %v186_v9 = vsel %vm183_vm2, %v176_v36, %v178_v37 }
 0x16e   :  { %v185_v13 = vsel %vm183_vm2, %v178_v37, %v180_v38  ;;  %v307_v22 = vmul.f32 %v271_v8, %v186_v9  ;;  %v277_v37 = vld [vmem:[#allocation2 + $0x58] sm:$0xff] }
 0x16f   :  { %v308_v25 = vmul.f32 %v272_v12, %v185_v13 }
 0x170   :  { %v182_v42 = vpop.permute.xlu0 %181 }
 0x171   :  { %v923_v43 = vpop.permute.xlu1 %188  ;;  %v184_v44 = vsel %vm183_vm2, %v180_v38, %v182_v42  ;;  %v187_v60 = vsel %vm183_vm2, %v182_v42, %v176_v36 }
 0x172   :  { %v309_v46 = vmul.f32 %v273_v41, %v184_v44  ;;  %v945_v10 = vmul.f32 %v270_v59, %v187_v60  ;;  %v278_v41 = vld [vmem:[#allocation2 + $0x60] sm:$0xff] }
 0x174   :  { %v191_v47 = vpop.permute.xlu0 %190  ;;  %v341_v48 = vpack.c.bf16 %v309_v46, %v305_v45  ;;  %v338_v28 = vpack.c.bf16 %v945_v10, %v957_v16  ;;  %v289_v46 = vld [vmem:[#allocation2 + $0xb8] sm:$0xff]  ;;  %v288_v16 = vld [vmem:[#allocation2 + $0xb0] sm:$0xff] }
 0x175   :  { %v193_v49 = vpop.permute.xlu1 %192  ;;  %v199_v18 = vsel %vm196_vm3, %v923_v43, %v191_v47 }
 0x176   :  { %423 = vmatprep.subr.bf16.mxu1 %v341_v48  ;;  %v198_v26 = vsel %vm196_vm3, %v191_v47, %v193_v49  ;;  %v311_v36 = vmul.f32 %v275_v17, %v199_v18 }
 0x178   :  { %v195_v50 = vpop.permute.xlu0 %194 }
 0x179   :  { %v202_v51 = vpop.permute.xlu1 %201  ;;  %v197_v38 = vsel %vm196_vm3, %v193_v49, %v195_v50 }
 0x17a   :  { %v313_v62 = vmul.f32 %v277_v37, %v197_v38 }
 0x17c   :  { %v204_v52 = vpop.permute.xlu0 %203 }
 0x17d   :  { %v206_v53 = vpop.permute.xlu1 %205  ;;  %v212_v27 = vsel %vm209_vm4, %v202_v51, %v204_v52 }
 0x17e   :  { %v211_v40 = vsel %vm209_vm4, %v204_v52, %v206_v53  ;;  %v276_v52 = vld [vmem:[#allocation2 + $0x50] sm:$0xff] }
 0x17f   :  { %v316_v63 = vmul.f32 %v280_v39, %v211_v40  ;;  %v312_v12 = vmul.f32 %v276_v52, %v198_v26  ;;  %v291_v39 = vld [vmem:[#allocation2 + $0xc8] sm:$0xff] }
 0x180   :  { %v208_v54 = vpop.permute.xlu0 %207 }
 0x181   :  { %v927_v55 = vpop.permute.xlu1 %214  ;;  %v210_v23 = vsel %vm209_vm4, %v206_v53, %v208_v54  ;;  %v213_v42 = vsel %vm209_vm4, %v208_v54, %v202_v51  ;;  %v274_v53 = vld [vmem:[#allocation2 + $0x40] sm:$0xff]  ;;  %v200_v51 = vsel %vm196_vm3, %v195_v50, %v923_v43  ;;  %v315_v54 = vmul.f32 %v279_v29, %v212_v27 }
 0x182   :  { %v317_v45 = vmul.f32 %v281_v24, %v210_v23  ;;  %v314_v4 = vmul.f32 %v278_v41, %v213_v42  ;;  %v310_v13 = vmul.f32 %v274_v53, %v200_v51  ;;  %v293_v23 = vld [vmem:[#allocation2 + $0xd8] sm:$0xff]  ;;  %v282_v27 = vld [vmem:[#allocation2 + $0x80] sm:$0xff]  ;;  %v296_v41 = vld [vmem:[#allocation2 + $0xf0] sm:$0xff] }
 0x183   :  { %v298_v53 = vld [vmem:[#allocation2 + $0x100] sm:$0xff] }
 0x184   :  { %v929_v56 = vpop.permute.xlu0 %216  ;;  %v345_v18 = vpack.c.bf16 %v317_v45, %v313_v62  ;;  %v342_v26 = vpack.c.bf16 %v314_v4, %v310_v13  ;;  %v294_v45 = vld [vmem:[#allocation2 + $0xe0] sm:$0xff] }
 0x185   :  { %v931_v57 = vpop.permute.xlu1 %218  ;;  %v225_v8 = vsel %vm222_vm5, %v927_v55, %v929_v56 }
 0x188   :  { %v933_v58 = vpop.permute.xlu0 %220 }
 0x189   :  { %v937_v61 = vpop.permute.xlu1 %227  ;;  %v226_v47 = vsel %vm222_vm5, %v933_v58, %v927_v55  ;;  %v223_v17 = vsel %vm222_vm5, %v931_v57, %v933_v58 }
 0x18a   :  { %v325_v43 = vmul.f32 %v289_v46, %v226_v47 }
 0x18c   :  { %v947_v11 = vpop.permute.xlu0 %229  ;;  %v349_v38 = vpack.c.bf16 %v325_v43, %v963_v20  ;;  %v318_v20 = vmul.f32 %v282_v27, %v855_v19  ;;  %v300_v43 = vld [vmem:[#allocation2 + $0x110] sm:$0xff] }
 0x18d   :  { %v955_v15 = vpop.permute.xlu1 %231 }
 0x190   :  { %v978_v35 = vpop.permute.xlu0 %233 }
 0x191   :  { %v163_v44 = vpop.permute.xlu1 %162  ;;  %v239_v55 = vsel %vm235_vm6, %v978_v35, %v937_v61  ;;  %v236_v52 = vsel %vm235_vm6, %v955_v15, %v978_v35 }
 0x192   :  { %v172_v48 = vsel %vm170_vm1, %v163_v44, %v914_v33  ;;  %v173_v49 = vsel %vm170_vm1, %v912_v31, %v163_v44  ;;  %v224_v33 = vsel %vm222_vm5, %v929_v56, %v931_v57  ;;  %v286_v31 = vld [vmem:[#allocation2 + $0xa0] sm:$0xff]  ;;  %v343_v56 = vpack.c.bf16 %v315_v54, %v311_v36  ;;  %v295_v57 = vld [vmem:[#allocation2 + $0xe8] sm:$0xff] }
 0x193   :  { %v303_v59 = vmul.f32 %v267_v30, %v173_v49  ;;  %v304_v60 = vmul.f32 %v268_v32, %v172_v48  ;;  %v323_v24 = vmul.f32 %v287_v6, %v224_v33  ;;  %v322_v29 = vmul.f32 %v286_v31, %v225_v8  ;;  %v292_v49 = vld [vmem:[#allocation2 + $0xd0] sm:$0xff]  ;;  %v299_v8 = vld [vmem:[#allocation2 + $0x108] sm:$0xff] }
 0x194   :  { %v243_v7 = vpop.permute.xlu0 %242  ;;  %v324_v30 = vmul.f32 %v288_v16, %v223_v17  ;;  %v237_v32 = vsel %vm235_vm6, %v947_v11, %v955_v15  ;;  %v329_v40 = vmul.f32 %v293_v23, %v239_v55  ;;  %v328_v35 = vmul.f32 %v292_v49, %v236_v52  ;;  %v705_v52 = vld [vmem:[%s1089_s3] sm:$0xff]   ;;  %s766_s3 = smov [#allocation5]  }
 0x195   :  { %v340_v50 = vpack.c.bf16 %v308_v25, %v304_v60  ;;  %v241_v9 = vpop.permute.xlu1 %240  ;;  %v339_v10 = vpack.c.bf16 %v307_v22, %v303_v59  ;;  %v297_v22 = vld [vmem:[#allocation2 + $0xf8] sm:$0xff]  ;;  %v344_v25 = vpack.c.bf16 %v316_v63, %v312_v12  ;;  %v347_v48 = vpack.c.bf16 %v323_v24, %v966_v21  ;;  %v290_v60 = vld [vmem:[#allocation2 + $0xc0] sm:$0xff]  ;;  %s650_s12 = sshll.u32 %s766_s3, 4  ;;  %s651_s12 = int_to_ptr.vmem [resolvable:$true] %s650_s12 }
 0x196   :  { %v251_v46 = vsel %vm248_vm7, %v241_v9, %v243_v7  ;;  %v348_v59 = vpack.c.bf16 %v324_v30, %v953_v14  ;;  %v238_v21 = vsel %vm235_vm6, %v937_v61, %v947_v11  ;;  %v327_v19 = vmul.f32 %v291_v39, %v237_v32  ;;  %s728_s13 = scalar_lea.vmem %s651_s12, 512  ;;  %p733_p9 = scmp.lt.s32.totalorder %s651_s12, %s651_s12 }
 0x197   :  { %382 = vmatprep.subr.bf16.mxu0 %v339_v10  ;;  %424 = vmatpush1.bf16.msra.mxu1 %v340_v50  ;;  %v346_v4 = vpack.c.bf16 %v322_v29, %v318_v20  ;;  %v330_v6 = vmul.f32 %v294_v45, %v251_v46  ;;  %v326_v31 = vmul.f32 %v290_v60, %v238_v21  ;;  %p729_p8 = scmp.ne.s32.totalorder %s651_s12, %s728_s13  ;;  %p734_p10 = scmp.lt.s32.totalorder %s728_s13, %s728_s13 }
 0x198   :  { %383 = vmatpush1.bf16.msra.mxu0 %v338_v28  ;;  %425 = vmatprep.subr.bf16.mxu1 %v345_v18  ;;  %v247_v58 = vpop.permute.xlu0 %246 }
 0x199   :  { %v245_v37 = vpop.permute.xlu1 %244  ;;  %384 = vmatprep.subr.bf16.mxu0 %v343_v56  ;;  %v252_v36 = vsel %vm248_vm7, %v247_v58, %v241_v9  ;;  %v350_v10 = vpack.c.bf16 %v330_v6, %v326_v31  ;;  %p735_p11 = por %p734_p10, %p733_p9 }
 0x19a   :  { %v250_v28 = vsel %vm248_vm7, %v243_v7, %v245_v37  ;;  %v249_v42 = vsel %vm248_vm7, %v245_v37, %v247_v58  ;;  %v333_v44 = vmul.f32 %v297_v22, %v252_v36  ;;  %v301_v7 = vld [vmem:[#allocation2 + $0x118] sm:$0xff] }
 0x19b   :  { %v331_v47 = vmul.f32 %v295_v57, %v250_v28  ;;  %426 = vmatpush1.bf16.msra.mxu1 %v344_v25  ;;  %v332_v62 = vmul.f32 %v296_v41, %v249_v42  ;;  %p736_p12 = pnand %p735_p11, %p729_p8 }
 0x19c   :  { %385 = vmatpush1.bf16.msra.mxu0 %v342_v26  ;;  %427 = vmatprep.subr.bf16.mxu1 %v349_v38  ;;  %v256_v51 = vpop.permute.xlu0 %255  ;;  %v353_v54 = vpack.c.bf16 %v333_v44, %v329_v40 }
 0x19d   :  { %v254_v63 = vpop.permute.xlu1 %253  ;;  %386 = vmatprep.subr.bf16.mxu0 %v347_v48  ;;  %v351_v14 = vpack.c.bf16 %v331_v47, %v327_v19  ;;  %v352_v11 = vpack.c.bf16 %v332_v62, %v328_v35  ;;  %v594_v19 = vunpack.c.h.bf16 %v822_v1  ;;  %v596_v62 = vunpack.c.h.bf16 %v832_v3 }
 0x19e   :  { %v264_v15 = vsel %vm261_vm8, %v254_v63, %v256_v51  ;;  %v597_v35 = vunpack.c.l.bf16 %v827_v2 }
 0x19f   :  { %v334_v33 = vmul.f32 %v298_v53, %v264_v15  ;;  %428 = vmatpush1.bf16.msra.mxu1 %v348_v59  ;;  %v595_v59 = vunpack.c.l.bf16 %v832_v3 }
 0x1a0   :  { %387 = vmatpush1.bf16.msra.mxu0 %v346_v4  ;;  %429 = vmatprep.subr.bf16.mxu1 %v353_v54  ;;  %v260_v61 = vpop.permute.xlu0 %259  ;;  %v593_v54 = vunpack.c.l.bf16 %v822_v1 }
 0x1a1   :  { %v258_v50 = vpop.permute.xlu1 %257  ;;  %v265_v9 = vsel %vm261_vm8, %v260_v61, %v254_v63  ;;  %388 = vmatprep.subr.bf16.mxu0 %v351_v14  ;;  %v354_v17 = vpack.c.bf16 %v334_v33, %v334_v33  ;;  %v599_v33 = vunpack.c.l.bf16 %v839_v5 }
 0x1a2   :  { %v263_v12 = vsel %vm261_vm8, %v256_v51, %v258_v50  ;;  %v262_v13 = vsel %vm261_vm8, %v258_v50, %v260_v61  ;;  %v337_v16 = vmul.f32 %v301_v7, %v265_v9  ;;  %v600_v61 = vunpack.c.h.bf16 %v839_v5 }
 0x1a3   :  { %v335_v18 = vmul.f32 %v299_v8, %v263_v12  ;;  %v336_v24 = vmul.f32 %v300_v43, %v262_v13  ;;  %430 = vmatpush1.bf16.msra.mxu1 %v352_v11  ;;  %v371_v22 = vsel %vm369_vm9, %v354_v17, 0  ;;  %v598_v43 = vunpack.c.h.bf16 %v827_v2 }
 0x1a4   :  { %v357_v23 = vpack.c.bf16 %v337_v16, %v337_v16  ;;  %389 = vmatpush1.bf16.msra.mxu0 %v350_v10 }
 0x1a5   :  { %v355_v55 = vpack.c.bf16 %v335_v18, %v335_v18  ;;  %v356_v56 = vpack.c.bf16 %v336_v24, %v336_v24 }
 0x1a6   :  { %670 = vmatprep.subr.msk.bf16.mxu1 %vm369_vm9, %v357_v23 }
 0x1a7   :  { %668 = vmatprep.subr.msk.bf16.mxu0 %vm369_vm9, %v355_v55  ;;  %v377_v25 = vsel %vm369_vm9, %v356_v56, 0 }
 0x1a8   :  { %391 = vmatpush1.bf16.msra.mxu0 %v371_v22  ;;  %432 = vmatpush1.bf16.msra.mxu1 %v377_v25 }
 0x1ab   :  { %669 = vmatmul.mubr.msk.bf16.vlgmr.msra.gmra.mrb[4].mxu0 %vm365_vm10, %v358_v34  ;;  %671 = vmatmul.mubr.msk.bf16.vlgmr.msra.gmra.mrb[4].mxu1 %vm365_vm10, %v358_v34 }
 0x1ac   :  { %539 = vmatprep.mubr.bf16.mxu0 %v757_v0  ;;  %582 = vmatprep.mubr.bf16.mxu1 %v757_v0 }
 0x1b1   :  { %v479_v53 = vpop.permute.xlu0 %478 }
 0x1b2   :  { %v363_v26 = vpop.permute.xlu1 %362 }
 0x1b6   :  { %v484_v51 = vpop.permute.xlu1 %483 }
 0x27e   :  { %v416_v29 = vpop.f32.mrb[4].mxu0  ;;  %v457_v57 = vpop.f32.mrb[4].mxu1 }
 0x27f   :  { %v417_v58 = vadd.f32 %v416_v29, %v363_v26  ;;  %v458_v27 = vadd.f32 %v457_v57, %v363_v26  ;;  %v418_v30 = vpop.f32.mrb[5].mxu0  ;;  %v459_v32 = vpop.f32.mrb[5].mxu1 }
 0x280   :  { %v419_v37 = vadd.f32 %v418_v30, %v363_v26  ;;  %v460_v36 = vadd.f32 %v459_v32, %v363_v26  ;;  %v420_v38 = vpop.f32.mrb[6].mxu0  ;;  %v461_v39 = vpop.f32.mrb[6].mxu1 }
 0x281   :  { %v464_v40 = vmax.f32 %v417_v58, 0.0  ;;  %v466_v28 = vmax.f32 %v458_v27, 0.0  ;;  %v421_v41 = vpop.f32.mrb[7].mxu0  ;;  %v462_v42 = vpop.f32.mrb[7].mxu1 }
 0x282   :  { %v465_v44 = vmax.f32 %v419_v37, 0.0  ;;  %v467_v45 = vmax.f32 %v460_v36, 0.0 }
 0x283   :  { %v468_v46 = vpack.c.bf16 %v464_v40, %v464_v40  ;;  %v470_v47 = vpack.c.bf16 %v466_v28, %v466_v28 }
 0x284   :  { %v469_v0 = vpack.c.bf16 %v465_v44, %v465_v44  ;;  %v471_v48 = vpack.c.bf16 %v467_v45, %v467_v45 }
 0x285   :  { %v496_v20 = vsel %vm369_vm9, %v468_v46, 0  ;;  %v502_v49 = vsel %vm369_vm9, %v470_v47, 0 }
 0x286   :  { %673 = vmatprep.subr.msk.bf16.mxu0 %vm369_vm9, %v469_v0  ;;  %675 = vmatprep.subr.msk.bf16.mxu1 %vm369_vm9, %v471_v48 }
 0x287   :  { %508 = vmatpush1.bf16.msra.mxu0 %v496_v20  ;;  %551 = vmatpush1.bf16.msra.mxu1 %v502_v49 }
 0x28a   :  { %674 = vmatmul.mubr.msk.bf16.vlgmr.msra.gmra.mrb[8].mxu0 %vm491_vm11, %v705_v52  ;;  %676 = vmatmul.mubr.msk.bf16.vlgmr.msra.gmra.mrb[8].mxu1 %vm491_vm11, %v705_v52 }
 0x35d   :  { %v541_v60 = vpop.f32.mrb[8].mxu0  ;;  %v584_v21 = vpop.f32.mrb[8].mxu1 }
 0x35e   :  { %v542_v63 = vadd.f32 %v541_v60, %v479_v53  ;;  %v585_v4 = vadd.f32 %v584_v21, %v479_v53  ;;  %v543_v6 = vpop.f32.mrb[9].mxu0  ;;  %v586_v15 = vpop.f32.mrb[9].mxu1 }
 0x35f   :  { %v544_v7 = vadd.f32 %v543_v6, %v479_v53  ;;  %v587_v14 = vadd.f32 %v586_v15, %v479_v53  ;;  %v545_v31 = vpop.f32.mrb[10].mxu0  ;;  %v588_v8 = vpop.f32.mrb[10].mxu1 }
 0x360   :  { %v601_v11 = vadd.f32 %v593_v54, %v542_v63  ;;  %v603_v1 = vadd.f32 %v595_v59, %v585_v4  ;;  %v546_v50 = vadd.f32 %v545_v31, %v484_v51  ;;  %v589_v3 = vadd.f32 %v588_v8, %v484_v51  ;;  %v547_v9 = vpop.f32.mrb[11].mxu0  ;;  %v590_v10 = vpop.f32.mrb[11].mxu1 }
 0x361   :  { %v602_v12 = vadd.f32 %v594_v19, %v544_v7  ;;  %v604_v13 = vadd.f32 %v596_v62, %v587_v14  ;;  %v548_v16 = vadd.f32 %v547_v9, %v484_v51  ;;  %v591_v17 = vadd.f32 %v590_v10, %v484_v51 }
 0x362   :  { %v609_v18 = vmax.f32 %v601_v11, 0.0  ;;  %v611_v24 = vmax.f32 %v603_v1, 0.0  ;;  %v605_v23 = vadd.f32 %v597_v35, %v546_v50  ;;  %v607_v55 = vadd.f32 %v599_v33, %v589_v3 }
 0x363   :  { %v610_v56 = vmax.f32 %v602_v12, 0.0  ;;  %v612_v22 = vmax.f32 %v604_v13, 0.0  ;;  %v606_v25 = vadd.f32 %v598_v43, %v548_v16  ;;  %v608_v2 = vadd.f32 %v600_v61, %v591_v17 }
 0x364   :  { %v613_v34 = vmax.f32 %v605_v23, 0.0  ;;  %v615_v5 = vmax.f32 %v607_v55, 0.0 }
 0x365   :  { %v681_v26 = vpack.c.bf16 %v610_v56, %v609_v18  ;;  %v682_v29 = vpack.c.bf16 %v612_v22, %v611_v24  ;;  %v614_v57 = vmax.f32 %v606_v25, 0.0  ;;  %v616_v58 = vmax.f32 %v608_v2, 0.0 }
 0x367   :  { %641 = vst [vmem:[#allocation5] sm:$0xff] %v681_v26  ;;  %642 = vst [vmem:[#allocation5 + $0x8] sm:$0xff] %v682_v29  ;;  %v683_v27 = vpack.c.bf16 %v614_v57, %v613_v34  ;;  %v684_v30 = vpack.c.bf16 %v616_v58, %v615_v5 }
 0x369   :  { %643 = vst [vmem:[#allocation5 + $0x10] sm:$0xff] %v683_v27  ;;  %644 = vst [vmem:[#allocation5 + $0x18] sm:$0xff] %v684_v30 }
 0x36a   :  { %739 = shalt.err (!%p736_p12)
}
 0x36b   :  { %s740_s15 = scalar_lea.hbm %s1092_s6, 512 }
 0x36c   :  { %p741_p13 = scmp.ne.s32.totalorder %s1092_s6, %s740_s15  ;;  %p744_p0 = scmp.lt.u32.totalorder %s740_s15, %s1092_s6 }
 0x36e   :  { %p746_p1 = pnand %p744_p0, %p741_p13 }
 0x370   :  { %749 = shalt.err (!%p746_p1)
}
 0x371   :  { %s767_s20 = smov 256  }
 0x372   :  { %656 = dma.vmem_to_hbm [thread:$0]  %s651_s12, 512, %s1092_s6, [#allocation4], %s767_s20, %s767_s20, %s759_s21  }
 0x373   :  { %752 = dma.done.wait [#allocation4], 512  }
 0x374   :  { %753 = vsyncadd [#allocation4], 4294966784 }
 0x375   :  { %660 = vsyncpa [#allocation3], 1 }
 0x376   :  { %661 = vsyncpa [#allocation4], 1 }

</bundles_post_ra>
